<compile_context>
chip_gen: v7x
topology: tpu7x:2x2x1
jax: 0.10.0
libtpu: 0.0.40
codegen_flags: <defaults>
</compile_context>

<pallas_src>
import functools

import jax
import jax.numpy as jnp
from jax.experimental import pallas as pl
from jax.experimental.pallas import tpu as pltpu


def _round_up(x, m):
    return ((x + m - 1) // m) * m


def gcn_kernel(a_sm, adj_ref, seq_ref, wt_ref, b_ref, out_ref, acc_ref):
    """One (row-tile i, reduction-tile k) step of PReLU((adj @ seq) @ W^T + b)."""
    k = pl.program_id(1)

    @pl.when(k == 0)
    def _():
        acc_ref[...] = jnp.zeros_like(acc_ref)

    # Graph aggregation partial sum: bf16 x bf16 -> f32 accumulate (MXU).
    acc_ref[...] += jnp.dot(adj_ref[...], seq_ref[...],
                            preferred_element_type=jnp.float32)

    @pl.when(k == pl.num_programs(1) - 1)
    def _():
        # Tiny projection [TM, in_ft] @ [in_ft, OUT_PAD] in f32 (negligible),
        # then bias + PReLU, stored lane-dense (OUT_PAD multiple of 128).
        out = jnp.dot(acc_ref[...], wt_ref[...],
                      preferred_element_type=jnp.float32)
        out = out + b_ref[...]
        a = a_sm[0]                      # PReLU slope from SMEM scalar
        out_ref[...] = jnp.where(out >= 0, out, a * out)


@functools.partial(jax.jit, static_argnames=("tm", "tk"))
def gcn_forward(seq, adj, weight, bias, prelu_a, *, tm=512, tk=1024):
    """seq: [N, in_ft], adj: [N, N] dense, weight: [out_ft, in_ft] (torch
    Linear layout), bias: [out_ft], prelu_a: scalar slope.  Returns [N, out_ft]
    float32."""
    N, in_ft = seq.shape
    out_ft = weight.shape[0]

    # Tile sizes (shrunk for small problems); adj block needs (8, 128) align.
    TM = min(tm, _round_up(N, 8))
    TK = min(tk, _round_up(N, 128))
    n_rows = _round_up(N, TM)           # padded row count  (grid axis 0)
    n_cols = _round_up(N, TK)           # padded reduction count (grid axis 1)
    OUT_PAD = _round_up(out_ft, 128)    # lane-dense output stores

    # HBM-side casts / zero-padding (bf16 halves the dominant adj traffic;
    # padded rows/cols are zero so they contribute nothing and are sliced off).
    adj_p = jnp.zeros((n_rows, n_cols), jnp.bfloat16)
    adj_p = adj_p.at[:N, :N].set(adj.astype(jnp.bfloat16))
    seq_p = jnp.zeros((n_cols, in_ft), jnp.bfloat16)
    seq_p = seq_p.at[:N, :].set(seq.astype(jnp.bfloat16))
    wt_p = jnp.zeros((in_ft, OUT_PAD), jnp.float32)
    wt_p = wt_p.at[:, :out_ft].set(weight.T.astype(jnp.float32))
    b_p = jnp.zeros((1, OUT_PAD), jnp.float32)
    b_p = b_p.at[0, :out_ft].set(bias.astype(jnp.float32))
    a_arr = jnp.asarray(prelu_a, jnp.float32).reshape(1)

    grid = (n_rows // TM, n_cols // TK)

    out = pl.pallas_call(
        gcn_kernel,
        out_shape=jax.ShapeDtypeStruct((n_rows, OUT_PAD), jnp.float32),
        grid_spec=pltpu.PrefetchScalarGridSpec(
            num_scalar_prefetch=1,           # PReLU slope lands in SMEM
            grid=grid,
            in_specs=[
                pl.BlockSpec((TM, TK), lambda i, k, a: (i, k)),        # adj
                pl.BlockSpec((TK, in_ft), lambda i, k, a: (k, 0)),     # seq
                pl.BlockSpec((in_ft, OUT_PAD), lambda i, k, a: (0, 0)),  # W^T
                pl.BlockSpec((1, OUT_PAD), lambda i, k, a: (0, 0)),      # bias
            ],
            out_specs=pl.BlockSpec((TM, OUT_PAD), lambda i, k, a: (i, 0)),
            scratch_shapes=[pltpu.VMEM((TM, in_ft), jnp.float32)],
        ),
        compiler_params=pltpu.CompilerParams(
            dimension_semantics=("parallel", "arbitrary"),
            vmem_limit_bytes=32 * 1024 * 1024,
        ),
    )(a_arr, adj_p, seq_p, wt_p, b_p)

    return out[:N, :out_ft]


def xavier_uniform(key, fan_out, fan_in):
    # matches torch.nn.init.xavier_uniform_ (gain=1)
    limit = (6.0 / (fan_in + fan_out)) ** 0.5
    return jax.random.uniform(key, (fan_out, fan_in), jnp.float32,
                              minval=-limit, maxval=limit)


if __name__ == "__main__":
    key = jax.random.PRNGKey(0)
    k_seq, k_adj, k_w = jax.random.split(key, 3)

    # Small, non-multiple-of-tile N to exercise the grid + padding paths.
    N, in_ft, out_ft = 200, 16, 32

    seq = jax.random.normal(k_seq, (N, in_ft), jnp.float32)
    # simple symmetric row-normalized-ish dense adjacency
    raw = jax.random.uniform(k_adj, (N, N), jnp.float32)
    adj = (raw + raw.T) / (2.0 * N)

    weight = xavier_uniform(k_w, out_ft, in_ft)   # torch Linear weight layout
    bias = jnp.zeros((out_ft,), jnp.float32)      # self.bias.data.fill_(0.0)
    prelu_a = 0.25                                # nn.PReLU default init

    # Small tiles for the tiny demo so grid = (2, 2) actually runs multi-tile.
    out = gcn_forward(seq, adj, weight, bias, prelu_a, tm=128, tk=128)
    jax.block_until_ready(out)

    # reference check in plain JAX (f32); kernel streams adj/seq as bf16 with
    # f32 accumulation, so tolerance is loosened accordingly.
    ref = adj @ (seq @ weight.T) + bias
    ref = jnp.where(ref >= 0, ref, prelu_a * ref)
    assert out.shape == ref.shape
    assert jnp.allclose(out, ref, atol=2e-2, rtol=2e-2), (
        float(jnp.max(jnp.abs(out - ref))))

    print("KERNEL_OK")
</pallas_src>

<mosaic_0001>
module attributes {stable_mosaic.version = 11 : i64} {
  func.func @gcn_kernel(%arg0: i32, %arg1: i32, %arg2: memref<1xf32, #tpu.memory_space<smem>>, %arg3: memref<128x128xbf16, #tpu.memory_space<vmem>>, %arg4: memref<128x16xbf16, #tpu.memory_space<vmem>>, %arg5: memref<16x128xf32, #tpu.memory_space<vmem>>, %arg6: memref<1x128xf32, #tpu.memory_space<vmem>>, %arg7: memref<128x128xf32, #tpu.memory_space<vmem>>, %arg8: memref<128x16xf32, #tpu.memory_space<vmem>>) attributes {dimension_semantics = [#tpu.dimension_semantics<parallel>, #tpu.dimension_semantics<arbitrary>], iteration_bounds = array<i64: 2, 2>, scalar_prefetch = 1 : i64, scratch_operands = 1 : i64, tpu.core_type = #tpu.core_type<tc>, window_params = [{transform_indices = @transform_0, window_bounds = array<i64: 128, 128>}, {transform_indices = @transform_1, window_bounds = array<i64: 128, 16>}, {pipeline_mode = #tpu.pipeline_mode<synchronous>, transform_indices = @transform_2, window_bounds = array<i64: 16, 128>}, {pipeline_mode = #tpu.pipeline_mode<synchronous>, transform_indices = @transform_3, window_bounds = array<i64: 1, 128>}, {transform_indices = @transform_4, window_bounds = array<i64: 128, 128>}]} {
    %c0_i32 = arith.constant 0 : i32
    %0 = arith.cmpi eq, %arg1, %c0_i32 : i32
    %1 = arith.extui %0 : i1 to i32
    %c0_i32_0 = arith.constant 0 : i32
    %2 = arith.cmpi ne, %1, %c0_i32_0 : i32
    scf.if %2 {
      %cst_9 = arith.constant 0.000000e+00 : f32
      %12 = vector.broadcast %cst_9 : f32 to vector<128x16xf32>
      %c0_10 = arith.constant 0 : index
      %c0_11 = arith.constant 0 : index
      %13 = vector.load %arg8[%c0_10, %c0_11] : memref<128x16xf32, #tpu.memory_space<vmem>>, vector<128x16xf32>
      tpu.vector_store %arg8[%c0_10, %c0_11], %12 {strides = array<i32>} : memref<128x16xf32, #tpu.memory_space<vmem>>, vector<128x16xf32>,
    } else {
    }
    %c0 = arith.constant 0 : index
    %c0_1 = arith.constant 0 : index
    %3 = vector.load %arg8[%c0, %c0_1] : memref<128x16xf32, #tpu.memory_space<vmem>>, vector<128x16xf32>
    %c0_2 = arith.constant 0 : index
    %c0_3 = arith.constant 0 : index
    %4 = vector.load %arg3[%c0_2, %c0_3] : memref<128x128xbf16, #tpu.memory_space<vmem>>, vector<128x128xbf16>
    %c0_4 = arith.constant 0 : index
    %c0_5 = arith.constant 0 : index
    %5 = vector.load %arg4[%c0_4, %c0_5] : memref<128x16xbf16, #tpu.memory_space<vmem>>, vector<128x16xbf16>
    %cst = arith.constant dense<0.000000e+00> : vector<128x16xf32>
    %6 = tpu.matmul %4, %5, %cst {dimension_numbers = #tpu.dot_dimension_numbers<[1], [0], [0], [1], [0, 0, 1, 1], [], []>} : vector<128x128xbf16>, vector<128x16xbf16>, vector<128x16xf32> -> vector<128x16xf32>
    %7 = arith.addf %3, %6 : vector<128x16xf32>
    %c0_6 = arith.constant 0 : index
    %c0_7 = arith.constant 0 : index
    %8 = vector.load %arg8[%c0_6, %c0_7] : memref<128x16xf32, #tpu.memory_space<vmem>>, vector<128x16xf32>
    tpu.vector_store %arg8[%c0_6, %c0_7], %7 {strides = array<i32>} : memref<128x16xf32, #tpu.memory_space<vmem>>, vector<128x16xf32>,
    %c1_i32 = arith.constant 1 : i32
    %9 = arith.cmpi eq, %arg1, %c1_i32 : i32
    %10 = arith.extui %9 : i1 to i32
    %c0_i32_8 = arith.constant 0 : i32
    %11 = arith.cmpi ne, %10, %c0_i32_8 : i32
    scf.if %11 {
      %c0_9 = arith.constant 0 : index
      %c0_10 = arith.constant 0 : index
      %12 = vector.load %arg8[%c0_9, %c0_10] : memref<128x16xf32, #tpu.memory_space<vmem>>, vector<128x16xf32>
      %c0_11 = arith.constant 0 : index
      %c0_12 = arith.constant 0 : index
      %13 = vector.load %arg5[%c0_11, %c0_12] : memref<16x128xf32, #tpu.memory_space<vmem>>, vector<16x128xf32>
      %cst_13 = arith.constant dense<0.000000e+00> : vector<128x128xf32>
      %14 = tpu.matmul %12, %13, %cst_13 {dimension_numbers = #tpu.dot_dimension_numbers<[1], [0], [0], [1], [0, 0, 1, 1], [], []>} : vector<128x16xf32>, vector<16x128xf32>, vector<128x128xf32> -> vector<128x128xf32>
      %c0_14 = arith.constant 0 : index
      %c0_15 = arith.constant 0 : index
      %15 = vector.load %arg6[%c0_14, %c0_15] : memref<1x128xf32, #tpu.memory_space<vmem>>, vector<1x128xf32>
      %16 = vector.broadcast %15 : vector<1x128xf32> to vector<128x128xf32>
      %17 = arith.addf %14, %16 : vector<128x128xf32>
      %c0_16 = arith.constant 0 : index
      %18 = memref.load %arg2[%c0_16] : memref<1xf32, #tpu.memory_space<smem>>
      %cst_17 = arith.constant 0.000000e+00 : f32
      %19 = vector.broadcast %cst_17 : f32 to vector<128x128xf32>
      %20 = arith.cmpf oge, %17, %19 : vector<128x128xf32>
      %21 = vector.broadcast %18 : f32 to vector<128x128xf32>
      %22 = arith.mulf %21, %17 : vector<128x128xf32>
      %23 = arith.select %20, %17, %22 : vector<128x128xi1>, vector<128x128xf32>
      %c0_18 = arith.constant 0 : index
      %c0_19 = arith.constant 0 : index
      %24 = vector.load %arg7[%c0_18, %c0_19] : memref<128x128xf32, #tpu.memory_space<vmem>>, vector<128x128xf32>
      tpu.vector_store %arg7[%c0_18, %c0_19], %23 {strides = array<i32>} : memref<128x128xf32, #tpu.memory_space<vmem>>, vector<128x128xf32>,
    } else {
    }
    return
  }
  func.func @transform_0(%arg0: i32, %arg1: i32, %arg2: memref<1xf32, #tpu.memory_space<smem>>) -> (i32, i32) {
    %c0_i32 = arith.constant 0 : i32
    return %arg0, %arg1 : i32, i32
  }
  func.func @transform_1(%arg0: i32, %arg1: i32, %arg2: memref<1xf32, #tpu.memory_space<smem>>) -> (i32, i32) {
    %c0_i32 = arith.constant 0 : i32
    %c0_i32_0 = arith.constant 0 : i32
    return %arg1, %c0_i32 : i32, i32
  }
  func.func @transform_2(%arg0: i32, %arg1: i32, %arg2: memref<1xf32, #tpu.memory_space<smem>>) -> (i32, i32) {
    %c0_i32 = arith.constant 0 : i32
    %c0_i32_0 = arith.constant 0 : i32
    %c0_i32_1 = arith.constant 0 : i32
    return %c0_i32, %c0_i32_0 : i32, i32
  }
  func.func @transform_3(%arg0: i32, %arg1: i32, %arg2: memref<1xf32, #tpu.memory_space<smem>>) -> (i32, i32) {
    %c0_i32 = arith.constant 0 : i32
    %c0_i32_0 = arith.constant 0 : i32
    %c0_i32_1 = arith.constant 0 : i32
    return %c0_i32, %c0_i32_0 : i32, i32
  }
  func.func @transform_4(%arg0: i32, %arg1: i32, %arg2: memref<1xf32, #tpu.memory_space<smem>>) -> (i32, i32) {
    %c0_i32 = arith.constant 0 : i32
    %c0_i32_0 = arith.constant 0 : i32
    return %arg0, %c0_i32 : i32, i32
  }
}

</mosaic_0001>

<bundles_post_ra>
// kernel: gcn_forward.1
= control target key start
LH: loop header
LB: loop body
LE: loop exit
PB: predicated region body
PF: predicated region fallthrough
CT: control target
= control target key end

     0   :  { %s1588_s0 = inlined_call_operand.<no memory space> [shape: f32[1], index: 0, kind: input, shape index: {}]   ;;  %s1589_s1 = inlined_call_operand.vmem [shape: bf16[256,256], index: 1, kind: input, shape index: {}]   ;;  %s1590_s2 = inlined_call_operand.vmem [shape: bf16[256,16], index: 2, kind: input, shape index: {}]   ;;  %s1591_s3 = inlined_call_operand.vmem [shape: f32[16,128], index: 3, kind: input, shape index: {}]   ;;  %s1592_s4 = inlined_call_operand.vmem [shape: f32[1,128], index: 4, kind: input, shape index: {}]   ;;  %s1593_s5 = inlined_call_operand.vmem [shape: f32[256,128], index: 5, kind: output, shape index: {}]  }
   0x1   :  { %10 = sst [smem:[#allocation4]] %s1588_s0 }
   0x2   :  { %s1345_s20 = smov 0   ;;  %s1347_s21 = smov 0  }
   0x3   :  { %s1349_s22 = smov 0   ;;  %s1351_s23 = smov 0  }
   0x4   :  { %s1353_s24 = smov 0   ;;  %s1355_s25 = smov 0  }
   0x5   :  { %s1357_s26 = smov 0  }
   0x6 LB: > { %s25_s0 = sadd.s32 1, %s1301_s24  ;;  %s28_s27 = sadd.s32 1, %s1305_s25  ;;  %s1309_s26 = sphi %s1357_s26, %s16_s26   ;;  %s1305_s25 = sphi %s1355_s25, %s1599_s25   ;;  %s1301_s24 = sphi %s1353_s24, %s1598_s24   ;;  %s1297_s23 = sphi %s1351_s23, %s1597_s23   ;;  %s1293_s22 = sphi %s1349_s22, %s1596_s22   ;;  %s1289_s21 = sphi %s1347_s21, %s1595_s21   ;;  %s1285_s20 = sphi %s1345_s20, %s1594_s20  }
   0x7   : > { %p26_p0 = scmp.ge.s32.totalorder %s25_s0, 2  ;;  %p44_p1 = scmp.ne.s32.totalorder %s1289_s21, %s1285_s20 }
   0x8   : > { %p45_p2 = scmp.eq.s32.totalorder %s1309_s26, 0  ;;  %s37_s6 = sadd.s32 1, %s1289_s21 }
   0x9   : > { %s1601_s0 = smov (%p26_p0, %s25_s0), 0  ;;  %s1603_s27 = smov (!%p26_p0, %s28_s27), %s1305_s25 }
   0xa   : > { %p46_p3 = por %p45_p2, %p44_p1  ;;  %p30_p4 = scmp.ge.s32.totalorder %s1603_s27, 2 }
   0xb   : > { %s33_s28 = ssub.s32 %s1301_s24, %s1601_s0  ;;  %p1017_p6 = scmp.ge.s32.totalorder %s1309_s26, 4 }
   0xc   : > { %s1605_s27 = smov (%p30_p4, %s1603_s27), 0 }
   0xd   : > { %s32_s29 = ssub.s32 %s1305_s25, %s1605_s27  ;;  %170 = sbr.rel (%p1017_p6) target bundleno = 36 (0x24), region = 24 }
   0xe   : > { %s34_s30 = sor.u32 %s33_s28, %s32_s29 }
   0xf   : > { %p35_p5 = scmp.eq.s32.totalorder %s34_s30, 0 }
  0x11   : > { %s1396_s7 = scalar_select %p35_p5, %s1289_s21, %s37_s6  }
  0x14   : > { %173 = sbr.rel (!%p46_p3) target bundleno = 36 (0x24), region = 28  ;;  %s175_s8 = sand.u32 (%p46_p3), 1, %s1289_s21  }
  0x15   : > { %s1065_s9 = sshll.u32 (%p46_p3), %s1305_s25, 5  ;;  %s1018_s10 = sshll.u32 (%p46_p3), %s175_s8, 6 }
  0x16   : > { %s180_s11 = sadd.s32 (%p46_p3), %s1301_s24, %s1065_s9  ;;  %s177_s16 = scalar_lea.vmem (%p46_p3), [#allocation5], %s1018_s10 }
  0x17   : > { %s1021_s12 = sshll.u32 (%p46_p3), %s180_s11, 2 }
  0x18   : > { %s1405_s15 = scalar_lea.vmem (%p46_p3), %s1589_s1, %s1021_s12 }
  0x19   : > { %v198_v0 = vld [vmem:[%s1405_s15] sm:$0xf] (%p46_p3)  ;;  %v200_v1 = vld [vmem:[%s1405_s15 + $0x8] sm:$0xf] (%p46_p3)  ;;  %v202_v2 = vld [vmem:[%s1405_s15 + $0x10] sm:$0xf] (%p46_p3) }
  0x1a   : > { %199 = vst [vmem:[%s177_s16] sm:$0xf] (%p46_p3), %v198_v0  ;;  %201 = vst [vmem:[%s177_s16 + $0x4] sm:$0xf] (%p46_p3), %v200_v1  ;;  %v204_v3 = vld [vmem:[%s1405_s15 + $0x18] sm:$0xf] (%p46_p3) }
  0x1b   : > { %203 = vst [vmem:[%s177_s16 + $0x8] sm:$0xf] %v202_v2  ;;  %v206_v4 = vld [vmem:[%s1405_s15 + $0x20] sm:$0xf]  ;;  %v208_v5 = vld [vmem:[%s1405_s15 + $0x28] sm:$0xf] }
  0x1c   : > { %205 = vst [vmem:[%s177_s16 + $0xc] sm:$0xf] %v204_v3  ;;  %207 = vst [vmem:[%s177_s16 + $0x10] sm:$0xf] %v206_v4  ;;  %v210_v6 = vld [vmem:[%s1405_s15 + $0x30] sm:$0xf] }
  0x1d   : > { %209 = vst [vmem:[%s177_s16 + $0x14] sm:$0xf] %v208_v5  ;;  %v212_v7 = vld [vmem:[%s1405_s15 + $0x38] sm:$0xf]  ;;  %v214_v8 = vld [vmem:[%s1405_s15 + $0x40] sm:$0xf] }
  0x1e   : > { %211 = vst [vmem:[%s177_s16 + $0x18] sm:$0xf] %v210_v6  ;;  %213 = vst [vmem:[%s177_s16 + $0x1c] sm:$0xf] %v212_v7  ;;  %v216_v9 = vld [vmem:[%s1405_s15 + $0x48] sm:$0xf] }
  0x1f   : > { %215 = vst [vmem:[%s177_s16 + $0x20] sm:$0xf] %v214_v8  ;;  %v218_v10 = vld [vmem:[%s1405_s15 + $0x50] sm:$0xf]  ;;  %v220_v11 = vld [vmem:[%s1405_s15 + $0x58] sm:$0xf] }
  0x20   : > { %217 = vst [vmem:[%s177_s16 + $0x24] sm:$0xf] %v216_v9  ;;  %219 = vst [vmem:[%s177_s16 + $0x28] sm:$0xf] %v218_v10  ;;  %v222_v12 = vld [vmem:[%s1405_s15 + $0x60] sm:$0xf] }
  0x21   : > { %221 = vst [vmem:[%s177_s16 + $0x2c] sm:$0xf] %v220_v11  ;;  %v224_v13 = vld [vmem:[%s1405_s15 + $0x68] sm:$0xf]  ;;  %v226_v14 = vld [vmem:[%s1405_s15 + $0x70] sm:$0xf] }
  0x22   : > { %223 = vst [vmem:[%s177_s16 + $0x30] sm:$0xf] %v222_v12  ;;  %225 = vst [vmem:[%s177_s16 + $0x34] sm:$0xf] %v224_v13  ;;  %v228_v15 = vld [vmem:[%s1405_s15 + $0x78] sm:$0xf] }
  0x23   : > { %227 = vst [vmem:[%s177_s16 + $0x38] sm:$0xf] %v226_v14  ;;  %229 = vst [vmem:[%s177_s16 + $0x3c] sm:$0xf] %v228_v15 }
  0x24 PF: > { %p1022_p7 = scmp.ge.s32.totalorder %s1309_s26, 1  ;;  %p292_p8 = scmp.lt.s32.totalorder %s1309_s26, 5 }
  0x26   : > { %p293_p9 = pnand %p1022_p7, %p292_p8 }
  0x27   : > { %s299_s17 = sand.u32 (!%p293_p9), 1, %s1285_s20   ;;  %s1024_s18 = sshll.u32 (!%p293_p9), %s1293_s22, 4 }
  0x28   : > { %296 = sbr.rel (%p293_p9) target bundleno = 547 (0x223), region = 73  ;;  %s1023_s19 = sshll.u32 (!%p293_p9), %s299_s17, 6 }
  0x29   : > { %p331_p10 = scmp.lt.s32.totalorder (!%p293_p9), %s1024_s18, 31  ;;  %s1026_s28 = sshll.u32 (!%p293_p9), %s1297_s23, 4 }
  0x2a   : > { %p337_p11 = scmp.lt.s32.totalorder (!%p293_p9), %s1026_s28, 31  ;;  %s1438_s20 = scalar_lea.vmem (!%p293_p9), [#allocation5], %s1023_s19 }
  0x2b   : > { %p1028_p12 = scmp.ne.s32.totalorder (!%p293_p9), %s1293_s22, 0 }
  0x2f   : > { %s1607_s18 = smov (!%p331_p10, %s1024_s18), 31  ;;  %s1609_s28 = smov (!%p337_p11, %s1026_s28), 31 }
  0x30   : > { %s1025_s29 = sshll.u32 %s1607_s18, 2  ;;  %s1027_s9 = sshll.u32 %s1609_s28, 3  ;;  %vm347_vm0 = vcmask (!%p1028_p12), 130048   ;;  %v1311_v16 = vmov (!%p1028_p12), 0.0  }
  0x31   : > { %s1431_s8 = scalar_lea.vmem %s1590_s2, %s1025_s29  ;;  %s1436_s12 = scalar_lea.vmem %s1593_s5, %s1027_s9  ;;  %348 = vst.msk [vmem:[#allocation2] sm:$0xff] (!%p1028_p12), %vm347_vm0, %v1311_v16  ;;  %349 = vst.msk [vmem:[#allocation2 + $0x8] sm:$0xff] (!%p1028_p12), %vm347_vm0, %v1311_v16 }
  0x32   : > { %346 = sbr.rel (%p1028_p12) target bundleno = 57 (0x39), region = 81  ;;  %350 = vst.msk [vmem:[#allocation2 + $0x10] sm:$0xff] (!%p1028_p12), %vm347_vm0, %v1311_v16  ;;  %351 = vst.msk [vmem:[#allocation2 + $0x18] sm:$0xff] (!%p1028_p12), %vm347_vm0, %v1311_v16 }
  0x33   : > { %352 = vst.msk [vmem:[#allocation2 + $0x20] sm:$0xff] (!%p1028_p12), %vm347_vm0, %v1311_v16  ;;  %353 = vst.msk [vmem:[#allocation2 + $0x28] sm:$0xff] (!%p1028_p12), %vm347_vm0, %v1311_v16 }
  0x34   : > { %354 = vst.msk [vmem:[#allocation2 + $0x30] sm:$0xff] (!%p1028_p12), %vm347_vm0, %v1311_v16  ;;  %355 = vst.msk [vmem:[#allocation2 + $0x38] sm:$0xff] (!%p1028_p12), %vm347_vm0, %v1311_v16 }
  0x35   : > { %356 = vst.msk [vmem:[#allocation2 + $0x40] sm:$0xff] (!%p1028_p12), %vm347_vm0, %v1311_v16  ;;  %357 = vst.msk [vmem:[#allocation2 + $0x48] sm:$0xff] (!%p1028_p12), %vm347_vm0, %v1311_v16 }
  0x36   : > { %358 = vst.msk [vmem:[#allocation2 + $0x50] sm:$0xff] (!%p1028_p12), %vm347_vm0, %v1311_v16  ;;  %359 = vst.msk [vmem:[#allocation2 + $0x58] sm:$0xff] (!%p1028_p12), %vm347_vm0, %v1311_v16 }
  0x37   : > { %360 = vst.msk [vmem:[#allocation2 + $0x60] sm:$0xff] (!%p1028_p12), %vm347_vm0, %v1311_v16  ;;  %361 = vst.msk [vmem:[#allocation2 + $0x68] sm:$0xff] (!%p1028_p12), %vm347_vm0, %v1311_v16 }
  0x38   : > { %362 = vst.msk [vmem:[#allocation2 + $0x70] sm:$0xff] (!%p1028_p12), %vm347_vm0, %v1311_v16  ;;  %363 = vst.msk [vmem:[#allocation2 + $0x78] sm:$0xff] (!%p1028_p12), %vm347_vm0, %v1311_v16 }
  0x39 PF: > { %v1239_v17 = vld [vmem:[%s1431_s8] sm:$0xff]   ;;  %v1240_v18 = vld [vmem:[%s1431_s8 + $0x8] sm:$0xff]   ;;  %v1241_v19 = vld [vmem:[%s1431_s8 + $0x10] sm:$0xff]   ;;  %vm621_vm1 = vcmask 130048   ;;  %p1045_p13 = scmp.ne.s32.totalorder %s1293_s22, 1 }
  0x3a   : > { %1100 = vmatprep.subr.bf16.mxu0 %v1239_v17  ;;  %1164 = vmatprep.subr.bf16.mxu1 %v1239_v17  ;;  %v1242_v20 = vld [vmem:[%s1431_s8 + $0x18] sm:$0xff]   ;;  %v1247_v21 = vld [vmem:[%s1438_s20] sm:$0xff]   ;;  %v1244_v24 = vld [vmem:[%s1431_s8 + $0x28] sm:$0xff]   ;;  %s860_s22 = sld [smem:[#allocation4]] (!%p1045_p13) }
  0x3b   : > { %1101 = vmatpush3.bf16.msra.mxu0 %v1239_v17  ;;  %1172 = vmatpush3.bf16.msra.mxu1 %v1239_v17  ;;  %v1248_v22 = vld [vmem:[%s1438_s20 + $0x20] sm:$0xff]   ;;  %v1245_v25 = vld [vmem:[%s1431_s8 + $0x30] sm:$0xff]   ;;  %v1246_v26 = vld [vmem:[%s1431_s8 + $0x38] sm:$0xff]  }
  0x3c   : > { %1102 = vmatprep.subr.bf16.mxu0 %v1240_v18  ;;  %1165 = vmatprep.subr.bf16.mxu1 %v1240_v18  ;;  %v1243_v23 = vld [vmem:[%s1431_s8 + $0x20] sm:$0xff]   ;;  %v1249_v27 = vld [vmem:[%s1438_s20 + $0x8] sm:$0xff]   ;;  %v1251_v29 = vld [vmem:[%s1438_s20 + $0x10] sm:$0xff]  }
  0x3d   : > { %1116 = vmatprep.mubr.bf16.mxu0 %v1247_v21  ;;  %1124 = vmatprep.mubr.bf16.mxu1 %v1248_v22  ;;  %v1250_v28 = vld [vmem:[%s1438_s20 + $0x28] sm:$0xff]   ;;  %v1252_v30 = vld [vmem:[%s1438_s20 + $0x30] sm:$0xff]   ;;  %v1253_v31 = vld [vmem:[%s1438_s20 + $0x18] sm:$0xff]  }
  0x3e   : > { %v1254_v32 = vld [vmem:[%s1438_s20 + $0x38] sm:$0xff]   ;;  %v366_v33 = vld [vmem:[#allocation2 + $0x10] sm:$0xff]  ;;  %v364_v35 = vld [vmem:[#allocation2] sm:$0xff] }
  0x3f   : > { %1103 = vmatpush3.bf16.msra.mxu0 %v1240_v18  ;;  %1173 = vmatpush3.bf16.msra.mxu1 %v1240_v18  ;;  %v374_v34 = vld [vmem:[#allocation2 + $0x50] sm:$0xff]  ;;  %v372_v36 = vld [vmem:[#allocation2 + $0x40] sm:$0xff]  ;;  %v367_v39 = vld [vmem:[#allocation2 + $0x18] sm:$0xff] }
  0x40   : > { %1104 = vmatprep.subr.bf16.mxu0 %v1241_v19  ;;  %1166 = vmatprep.subr.bf16.mxu1 %v1241_v19  ;;  %v375_v40 = vld [vmem:[#allocation2 + $0x58] sm:$0xff]  ;;  %v365_v45 = vld [vmem:[#allocation2 + $0x8] sm:$0xff]  ;;  %v370_v57 = vld [vmem:[#allocation2 + $0x30] sm:$0xff] }
  0x41   : > { %v373_v46 = vld [vmem:[#allocation2 + $0x48] sm:$0xff]  ;;  %v378_v58 = vld [vmem:[#allocation2 + $0x70] sm:$0xff]  ;;  %v368_v59 = vld [vmem:[#allocation2 + $0x20] sm:$0xff] }
  0x42   : > { %v376_v60 = vld [vmem:[#allocation2 + $0x60] sm:$0xff]  ;;  %v371_v63 = vld [vmem:[#allocation2 + $0x38] sm:$0xff]  ;;  %v369_v5 = vld [vmem:[#allocation2 + $0x28] sm:$0xff] }
  0x43   : > { %1105 = vmatpush3.bf16.msra.mxu0 %v1241_v19  ;;  %1174 = vmatpush3.bf16.msra.mxu1 %v1241_v19  ;;  %v379_v0 = vld [vmem:[#allocation2 + $0x78] sm:$0xff]  ;;  %v377_v6 = vld [vmem:[#allocation2 + $0x68] sm:$0xff]  ;;  %v658_v17 = vld [vmem:[%s1591_s3] sm:$0xff] (!%p1045_p13) }
  0x44   : > { %1106 = vmatprep.subr.bf16.mxu0 %v1242_v20  ;;  %1167 = vmatprep.subr.bf16.mxu1 %v1242_v20  ;;  %v659_v18 = vld [vmem:[%s1591_s3 + $0x8] sm:$0xff] (!%p1045_p13) }
  0x47   : > { %1107 = vmatpush3.bf16.msra.mxu0 %v1242_v20  ;;  %1175 = vmatpush3.bf16.msra.mxu1 %v1242_v20  ;;  %v1160_v20 = vpack.c.bf16 (!%p1045_p13), %v659_v18, %v658_v17 }
  0x48   : > { %1108 = vmatprep.subr.bf16.mxu0 %v1243_v23  ;;  %1168 = vmatprep.subr.bf16.mxu1 %v1243_v23 }
  0x4b   : > { %1109 = vmatpush3.bf16.msra.mxu0 %v1243_v23  ;;  %1176 = vmatpush3.bf16.msra.mxu1 %v1243_v23 }
  0x4c   : > { %1110 = vmatprep.subr.bf16.mxu0 %v1244_v24  ;;  %1169 = vmatprep.subr.bf16.mxu1 %v1244_v24 }
  0x4f   : > { %1111 = vmatpush3.bf16.msra.mxu0 %v1244_v24  ;;  %1177 = vmatpush3.bf16.msra.mxu1 %v1244_v24 }
  0x50   : > { %1112 = vmatprep.subr.bf16.mxu0 %v1245_v25  ;;  %1170 = vmatprep.subr.bf16.mxu1 %v1245_v25 }
  0x53   : > { %1113 = vmatpush3.bf16.msra.mxu0 %v1245_v25  ;;  %1178 = vmatpush3.bf16.msra.mxu1 %v1245_v25 }
  0x54   : > { %1114 = vmatprep.subr.bf16.mxu0 %v1246_v26  ;;  %1171 = vmatprep.subr.bf16.mxu1 %v1246_v26 }
  0x57   : > { %1115 = vmatpush3.bf16.msra.mxu0 %v1246_v26  ;;  %1179 = vmatpush3.bf16.msra.mxu1 %v1246_v26 }
  0x58   : > { %1161 = vmatprep.subr.bf16.mxu0 (!%p1045_p13), %v1160_v20  ;;  %1180 = vmatprep.subr.bf16.mxu1 (!%p1045_p13), %v1160_v20 }
  0x5a   : > { %1117 = vmatmul.mubr.bf16.vlgmr.msra.gmra.mrb[0].mxu0 %v1249_v27  ;;  %1125 = vmatmul.mubr.bf16.vlgmr.msra.gmra.mrb[0].mxu1 %v1250_v28 }
  0x5b   : > { %1120 = vmatprep.mubr.bf16.mxu0 %v1251_v29  ;;  %1128 = vmatprep.mubr.bf16.mxu1 %v1252_v30 }
  0x5c   : > { %1163 = vmatpush3.bf16.msra.mxu0 (!%p1045_p13), %v1160_v20  ;;  %1181 = vmatpush3.bf16.msra.mxu1 (!%p1045_p13), %v1160_v20 }
  0x62   : > { %1121 = vmatmul.mubr.bf16.gmra.mrb[4].mxu0 %v1253_v31  ;;  %1129 = vmatmul.mubr.bf16.gmra.mrb[4].mxu1 %v1254_v32 }
 0x12d   : > { %v1118_v37 = vpop.f32.mrb[0].mxu0  ;;  %v1126_v38 = vpop.f32.mrb[0].mxu1 }
 0x12e   : > { %v607_v41 = vadd.f32 %v1118_v37, %v366_v33  ;;  %v615_v42 = vadd.f32 %v1126_v38, %v374_v34  ;;  %v542_v43 = vpop.f32.mrb[1].mxu0  ;;  %v574_v44 = vpop.f32.mrb[1].mxu1  ;;  %v1517_v38 = vstv (!%p1045_p13), %s860_s22 }
 0x12f   : > { %v605_v47 = vadd.f32 %v542_v43, %v364_v35  ;;  %v613_v48 = vadd.f32 %v574_v44, %v372_v36  ;;  %v1119_v49 = vpop.f32.mrb[2].mxu0  ;;  %v1127_v50 = vpop.f32.mrb[2].mxu1  ;;  %v1515_v36 = vld [vmem:[%s1592_s4] ss:$0 sm:$0xff] (!%p1045_p13) }
 0x130   : > { %624 = vst.msk [vmem:[#allocation2 + $0x10] sm:$0xff] %vm621_vm1, %v607_v41  ;;  %632 = vst.msk [vmem:[#allocation2 + $0x50] sm:$0xff] %vm621_vm1, %v615_v42  ;;  %v608_v51 = vadd.f32 %v1119_v49, %v367_v39  ;;  %v616_v52 = vadd.f32 %v1127_v50, %v375_v40  ;;  %v545_v53 = vpop.f32.mrb[3].mxu0  ;;  %v577_v54 = vpop.f32.mrb[3].mxu1 }
 0x131   : > { %622 = vst.msk [vmem:[#allocation2] sm:$0xff] %vm621_vm1, %v605_v47  ;;  %630 = vst.msk [vmem:[#allocation2 + $0x40] sm:$0xff] %vm621_vm1, %v613_v48  ;;  %v606_v55 = vadd.f32 %v545_v53, %v365_v45  ;;  %v614_v56 = vadd.f32 %v577_v54, %v373_v46 }
 0x132   : > { %625 = vst.msk [vmem:[#allocation2 + $0x18] sm:$0xff] %vm621_vm1, %v608_v51  ;;  %633 = vst.msk [vmem:[#allocation2 + $0x58] sm:$0xff] %vm621_vm1, %v616_v52 }
 0x133   : > { %623 = vst.msk [vmem:[#allocation2 + $0x8] sm:$0xff] %vm621_vm1, %v606_v55  ;;  %631 = vst.msk [vmem:[#allocation2 + $0x48] sm:$0xff] %vm621_vm1, %v614_v56 }
 0x135   : > { %v1122_v61 = vpop.f32.mrb[4].mxu0  ;;  %v1130_v62 = vpop.f32.mrb[4].mxu1  ;;  %641 = sbr.rel (%p1045_p13) target bundleno = 547 (0x223), region = 85 }
 0x136   : > { %v611_v1 = vadd.f32 %v1122_v61, %v370_v57  ;;  %v619_v2 = vadd.f32 %v1130_v62, %v378_v58  ;;  %v558_v3 = vpop.f32.mrb[5].mxu0  ;;  %v590_v4 = vpop.f32.mrb[5].mxu1 }
 0x137   : > { %v609_v7 = vadd.f32 %v558_v3, %v368_v59  ;;  %v617_v8 = vadd.f32 %v590_v4, %v376_v60  ;;  %v1123_v9 = vpop.f32.mrb[6].mxu0  ;;  %v1131_v10 = vpop.f32.mrb[6].mxu1  ;;  %v644_v24 = vld [vmem:[#allocation2 + $0x10] sm:$0xff] (!%p1045_p13) }
 0x138   : > { %628 = vst.msk [vmem:[#allocation2 + $0x30] sm:$0xff] %vm621_vm1, %v611_v1  ;;  %636 = vst.msk [vmem:[#allocation2 + $0x70] sm:$0xff] %vm621_vm1, %v619_v2  ;;  %v612_v11 = vadd.f32 %v1123_v9, %v371_v63  ;;  %v620_v12 = vadd.f32 %v1131_v10, %v379_v0  ;;  %v561_v13 = vpop.f32.mrb[7].mxu0  ;;  %v593_v14 = vpop.f32.mrb[7].mxu1  ;;  %v642_v19 = vld [vmem:[#allocation2] sm:$0xff] (!%p1045_p13)  ;;  %v652_v25 = vld [vmem:[#allocation2 + $0x50] sm:$0xff] (!%p1045_p13) }
 0x139   : > { %626 = vst.msk [vmem:[#allocation2 + $0x20] sm:$0xff] %vm621_vm1, %v609_v7  ;;  %634 = vst.msk [vmem:[#allocation2 + $0x60] sm:$0xff] %vm621_vm1, %v617_v8  ;;  %v610_v15 = vadd.f32 %v561_v13, %v369_v5  ;;  %v618_v16 = vadd.f32 %v593_v14, %v377_v6  ;;  %1136 = vmatprep.mubr.msk.f32.mxu0 (!%p1045_p13), %vm621_vm1, %v642_v19  ;;  %v650_v21 = vld [vmem:[#allocation2 + $0x40] sm:$0xff] (!%p1045_p13)  ;;  %v645_v26 = vld [vmem:[#allocation2 + $0x18] sm:$0xff] (!%p1045_p13) }
 0x13a   : > { %629 = vst.msk [vmem:[#allocation2 + $0x38] sm:$0xff] %vm621_vm1, %v612_v11  ;;  %637 = vst.msk [vmem:[#allocation2 + $0x78] sm:$0xff] %vm621_vm1, %v620_v12  ;;  %1148 = vmatprep.mubr.msk.f32.mxu1 (!%p1045_p13), %vm621_vm1, %v650_v21  ;;  %v643_v22 = vld [vmem:[#allocation2 + $0x8] sm:$0xff] (!%p1045_p13)  ;;  %v653_v27 = vld [vmem:[#allocation2 + $0x58] sm:$0xff] (!%p1045_p13) }
 0x13b   : > { %627 = vst.msk [vmem:[#allocation2 + $0x28] sm:$0xff] %vm621_vm1, %v610_v15  ;;  %635 = vst.msk [vmem:[#allocation2 + $0x68] sm:$0xff] %vm621_vm1, %v618_v16  ;;  %v651_v23 = vld [vmem:[#allocation2 + $0x48] sm:$0xff] (!%p1045_p13)  ;;  %1137 = vmatmul.mubr.msk.f32.vlgmr.msra.gmra.mrb[0].mxu0 (!%p1045_p13), %vm621_vm1, %v643_v22 }
 0x13c   : > { %1149 = vmatmul.mubr.msk.f32.vlgmr.msra.gmra.mrb[0].mxu1 %vm621_vm1, %v651_v23  ;;  %1139 = vmatprep.mubr.msk.f32.mxu0 %vm621_vm1, %v644_v24 }
 0x13d   : > { %1151 = vmatprep.mubr.msk.f32.mxu1 %vm621_vm1, %v652_v25 }
 0x13f   : > { %1140 = vmatmul.mubr.msk.f32.gmra.mrb[2].mxu0 %vm621_vm1, %v645_v26  ;;  %v648_v32 = vld [vmem:[#allocation2 + $0x30] sm:$0xff] }
 0x140   : > { %v646_v28 = vld [vmem:[#allocation2 + $0x20] sm:$0xff]  ;;  %1152 = vmatmul.mubr.msk.f32.gmra.mrb[2].mxu1 %vm621_vm1, %v653_v27  ;;  %v656_v33 = vld [vmem:[#allocation2 + $0x70] sm:$0xff] }
 0x141   : > { %v654_v29 = vld [vmem:[#allocation2 + $0x60] sm:$0xff]  ;;  %1142 = vmatprep.mubr.msk.f32.mxu0 %vm621_vm1, %v646_v28  ;;  %v649_v34 = vld [vmem:[#allocation2 + $0x38] sm:$0xff] }
 0x142   : > { %1154 = vmatprep.mubr.msk.f32.mxu1 %vm621_vm1, %v654_v29  ;;  %v647_v30 = vld [vmem:[#allocation2 + $0x28] sm:$0xff]  ;;  %v657_v35 = vld [vmem:[#allocation2 + $0x78] sm:$0xff] }
 0x143   : > { %v655_v31 = vld [vmem:[#allocation2 + $0x68] sm:$0xff]  ;;  %1143 = vmatmul.mubr.msk.f32.gmra.mrb[4].mxu0 %vm621_vm1, %v647_v30 }
 0x144   : > { %1155 = vmatmul.mubr.msk.f32.gmra.mrb[4].mxu1 %vm621_vm1, %v655_v31  ;;  %1145 = vmatprep.mubr.msk.f32.mxu0 %vm621_vm1, %v648_v32 }
 0x145   : > { %1157 = vmatprep.mubr.msk.f32.mxu1 %vm621_vm1, %v656_v33 }
 0x147   : > { %1146 = vmatmul.mubr.msk.f32.gmra.mrb[6].mxu0 %vm621_vm1, %v649_v34 }
 0x148   : > { %1158 = vmatmul.mubr.msk.f32.gmra.mrb[6].mxu1 %vm621_vm1, %v657_v35 }
 0x20e   : > { %v1138_v37 = vpop.f32.mrb[0].mxu0 }
 0x20f   : > { %v1150_v39 = vpop.f32.mrb[0].mxu1  ;;  %v787_v40 = vadd.f32 %v1138_v37, %v1515_v36  ;;  %v781_v42 = vpop.f32.mrb[1].mxu0 }
 0x210   : > { %v827_v41 = vadd.f32 %v1150_v39, %v1515_v36  ;;  %v821_v43 = vpop.f32.mrb[1].mxu1  ;;  %v782_v44 = vadd.f32 %v1515_v36, %v781_v42 }
 0x211   : > { %v822_v45 = vadd.f32 %v1515_v36, %v821_v43  ;;  %vm862_vm2 = vcmp.ge.f32.partialorder %v787_v40, 0.0  ;;  %v879_v46 = vmul.f32 %v1517_v38, %v787_v40 }
 0x212   : > { %vm870_vm3 = vcmp.ge.f32.partialorder %v827_v41, 0.0  ;;  %v887_v47 = vmul.f32 %v1517_v38, %v827_v41  ;;  %vm861_vm4 = vcmp.ge.f32.partialorder %v782_v44, 0.0  ;;  %v878_v48 = vmul.f32 %v1517_v38, %v782_v44  ;;  %v1141_v50 = vpop.f32.mrb[2].mxu0 }
 0x213   : > { %vm869_vm5 = vcmp.ge.f32.partialorder %v822_v45, 0.0  ;;  %v886_v49 = vmul.f32 %v1517_v38, %v822_v45  ;;  %v1153_v51 = vpop.f32.mrb[2].mxu1  ;;  %v895_v52 = vsel %vm862_vm2, %v787_v40, %v879_v46  ;;  %v797_v54 = vadd.f32 %v1141_v50, %v1515_v36  ;;  %v791_v56 = vpop.f32.mrb[3].mxu0 }
 0x214   : > { %v903_v53 = vsel %vm870_vm3, %v827_v41, %v887_v47  ;;  %v837_v55 = vadd.f32 %v1153_v51, %v1515_v36  ;;  %v831_v57 = vpop.f32.mrb[3].mxu1  ;;  %911 = vst [vmem:[%s1436_s12 + $0x8] sm:$0xff] %v895_v52  ;;  %v894_v58 = vsel %vm861_vm4, %v782_v44, %v878_v48  ;;  %v792_v60 = vadd.f32 %v1515_v36, %v791_v56 }
 0x215   : > { %919 = vst [vmem:[%s1436_s12 + $0x48] sm:$0xff] %v903_v53  ;;  %v902_v59 = vsel %vm869_vm5, %v822_v45, %v886_v49  ;;  %v832_v61 = vadd.f32 %v1515_v36, %v831_v57  ;;  %910 = vst [vmem:[%s1436_s12] sm:$0xff] %v894_v58  ;;  %vm864_vm6 = vcmp.ge.f32.partialorder %v797_v54, 0.0  ;;  %v881_v62 = vmul.f32 %v1517_v38, %v797_v54 }
 0x216   : > { %918 = vst [vmem:[%s1436_s12 + $0x40] sm:$0xff] %v902_v59  ;;  %vm872_vm7 = vcmp.ge.f32.partialorder %v837_v55, 0.0  ;;  %v889_v63 = vmul.f32 %v1517_v38, %v837_v55  ;;  %vm863_vm8 = vcmp.ge.f32.partialorder %v792_v60, 0.0  ;;  %v880_v0 = vmul.f32 %v1517_v38, %v792_v60  ;;  %v1144_v2 = vpop.f32.mrb[4].mxu0 }
 0x217   : > { %vm871_vm9 = vcmp.ge.f32.partialorder %v832_v61, 0.0  ;;  %v888_v1 = vmul.f32 %v1517_v38, %v832_v61  ;;  %v1156_v3 = vpop.f32.mrb[4].mxu1  ;;  %v897_v4 = vsel %vm864_vm6, %v797_v54, %v881_v62  ;;  %v807_v6 = vadd.f32 %v1144_v2, %v1515_v36  ;;  %v801_v8 = vpop.f32.mrb[5].mxu0 }
 0x218   : > { %v905_v5 = vsel %vm872_vm7, %v837_v55, %v889_v63  ;;  %v847_v7 = vadd.f32 %v1156_v3, %v1515_v36  ;;  %v841_v9 = vpop.f32.mrb[5].mxu1  ;;  %913 = vst [vmem:[%s1436_s12 + $0x18] sm:$0xff] %v897_v4  ;;  %v896_v10 = vsel %vm863_vm8, %v792_v60, %v880_v0  ;;  %v802_v12 = vadd.f32 %v1515_v36, %v801_v8 }
 0x219   : > { %921 = vst [vmem:[%s1436_s12 + $0x58] sm:$0xff] %v905_v5  ;;  %v904_v11 = vsel %vm871_vm9, %v832_v61, %v888_v1  ;;  %v842_v13 = vadd.f32 %v1515_v36, %v841_v9  ;;  %912 = vst [vmem:[%s1436_s12 + $0x10] sm:$0xff] %v896_v10  ;;  %vm866_vm10 = vcmp.ge.f32.partialorder %v807_v6, 0.0  ;;  %v883_v14 = vmul.f32 %v1517_v38, %v807_v6 }
 0x21a   : > { %920 = vst [vmem:[%s1436_s12 + $0x50] sm:$0xff] %v904_v11  ;;  %vm874_vm11 = vcmp.ge.f32.partialorder %v847_v7, 0.0  ;;  %v891_v15 = vmul.f32 %v1517_v38, %v847_v7  ;;  %vm865_vm12 = vcmp.ge.f32.partialorder %v802_v12, 0.0  ;;  %v882_v16 = vmul.f32 %v1517_v38, %v802_v12  ;;  %v1147_v18 = vpop.f32.mrb[6].mxu0 }
 0x21b   : > { %vm873_vm13 = vcmp.ge.f32.partialorder %v842_v13, 0.0  ;;  %v890_v17 = vmul.f32 %v1517_v38, %v842_v13  ;;  %v1159_v19 = vpop.f32.mrb[6].mxu1  ;;  %v899_v20 = vsel %vm866_vm10, %v807_v6, %v883_v14  ;;  %v817_v22 = vadd.f32 %v1147_v18, %v1515_v36  ;;  %v811_v24 = vpop.f32.mrb[7].mxu0 }
 0x21c   : > { %v907_v21 = vsel %vm874_vm11, %v847_v7, %v891_v15  ;;  %v857_v23 = vadd.f32 %v1159_v19, %v1515_v36  ;;  %v851_v25 = vpop.f32.mrb[7].mxu1  ;;  %915 = vst [vmem:[%s1436_s12 + $0x28] sm:$0xff] %v899_v20  ;;  %v898_v26 = vsel %vm865_vm12, %v802_v12, %v882_v16  ;;  %v812_v28 = vadd.f32 %v1515_v36, %v811_v24 }
 0x21d   : > { %923 = vst [vmem:[%s1436_s12 + $0x68] sm:$0xff] %v907_v21  ;;  %v906_v27 = vsel %vm873_vm13, %v842_v13, %v890_v17  ;;  %v852_v29 = vadd.f32 %v1515_v36, %v851_v25  ;;  %914 = vst [vmem:[%s1436_s12 + $0x20] sm:$0xff] %v898_v26  ;;  %vm868_vm14 = vcmp.ge.f32.partialorder %v817_v22, 0.0  ;;  %v885_v30 = vmul.f32 %v1517_v38, %v817_v22 }
 0x21e   : > { %922 = vst [vmem:[%s1436_s12 + $0x60] sm:$0xff] %v906_v27  ;;  %vm876_vm15 = vcmp.ge.f32.partialorder %v857_v23, 0.0  ;;  %v893_v31 = vmul.f32 %v1517_v38, %v857_v23  ;;  %vm867_vm0 = vcmp.ge.f32.partialorder %v812_v28, 0.0  ;;  %v884_v32 = vmul.f32 %v1517_v38, %v812_v28 }
 0x21f   : > { %vm875_vm1 = vcmp.ge.f32.partialorder %v852_v29, 0.0  ;;  %v892_v33 = vmul.f32 %v1517_v38, %v852_v29  ;;  %v901_v34 = vsel %vm868_vm14, %v817_v22, %v885_v30 }
 0x220   : > { %v909_v35 = vsel %vm876_vm15, %v857_v23, %v893_v31  ;;  %917 = vst [vmem:[%s1436_s12 + $0x38] sm:$0xff] %v901_v34  ;;  %v900_v36 = vsel %vm867_vm0, %v812_v28, %v884_v32 }
 0x221   : > { %925 = vst [vmem:[%s1436_s12 + $0x78] sm:$0xff] %v909_v35  ;;  %v908_v37 = vsel %vm875_vm1, %v852_v29, %v892_v33  ;;  %916 = vst [vmem:[%s1436_s12 + $0x30] sm:$0xff] %v900_v36 }
 0x222   : > { %924 = vst [vmem:[%s1436_s12 + $0x70] sm:$0xff] %v908_v37 }
 0x223 PF: > { %s16_s26 = sadd.s32 1, %s1309_s26   ;;  %s1594_s20 = smov %s1289_s21 }
 0x224   : > { %p13_p0 = scmp.ge.s32.totalorder %s16_s26, 6   ;;  %s1595_s21 = smov %s1396_s7 }
 0x225   : > { %s1596_s22 = smov %s1301_s24  ;;  %s1597_s23 = smov %s1305_s25 }
 0x226   : > { %s1598_s24 = smov %s1601_s0  ;;  %s1599_s25 = smov %s1605_s27 }
 0x227   :  { %15 = sbr.rel (!%p13_p0) target bundleno = 6 (0x6), region = 123 }

</bundles_post_ra>
